<compile_context>
chip_gen: v6e
topology: v6e:2x2x1
jax: 0.10.0
libtpu: 0.0.40
codegen_flags: <defaults>
</compile_context>

<pallas_src>
import functools

import jax
import jax.numpy as jnp
from jax.experimental import pallas as pl
from jax.experimental.pallas import tpu as pltpu

_LANE = 128
_SUBLANE_BF16 = 16


def _cdiv(a: int, b: int) -> int:
    return -(-a // b)


def _pad_to(n: int, m: int) -> int:
    return _cdiv(n, m) * m


def _mlp_kernel(x_ref,
                w1_ref, b1_ref,
                w2_ref, b2_ref,
                w3_ref, b3_ref,
                w4_ref, b4_ref,
                o_ref):
    # One batch tile fully resident in VMEM; all 4 matmuls + ReLUs fused so
    # intermediates never touch HBM.  Matmul inputs are bf16 (MXU-native),
    # accumulation / bias / ReLU are f32, final store is bf16 lane-dense.
    x = x_ref[...].astype(jnp.bfloat16)                              # (tb, Din)

    h = jnp.dot(x, w1_ref[...], preferred_element_type=jnp.float32) + b1_ref[...]
    h = jnp.maximum(h, 0.0)
    # dropout1: identity (eval mode)

    h = jnp.dot(h.astype(jnp.bfloat16), w2_ref[...],
                preferred_element_type=jnp.float32) + b2_ref[...]
    h = jnp.maximum(h, 0.0)
    # dropout2: identity (eval mode)

    h = jnp.dot(h.astype(jnp.bfloat16), w3_ref[...],
                preferred_element_type=jnp.float32) + b3_ref[...]
    h = jnp.maximum(h, 0.0)
    # dropout3: identity (eval mode)

    out = jnp.dot(h.astype(jnp.bfloat16), w4_ref[...],
                  preferred_element_type=jnp.float32) + b4_ref[...]
    o_ref[...] = out.astype(jnp.bfloat16)                            # (tb, C_p) bf16


@functools.partial(jax.jit, static_argnames=())
def blurry_lines_classifier(x, params):
    """x: [batch, input_dim] float32.  params: dict name -> (W, b),
    W stored as [in_features, out_features], b as [1, out_features]."""
    w1, b1 = params["fc1"]
    w2, b2 = params["fc2"]
    w3, b3 = params["fc3"]
    w4, b4 = params["out"]

    batch, input_dim = x.shape
    hidden1 = w1.shape[1]
    hidden2 = w2.shape[1]
    hidden3 = w3.shape[1]
    num_classes = w4.shape[1]

    # --- lane-dense padding of weight OUTPUT dims to multiples of 128 --------
    # fc1's input (K) dim stays at input_dim because x is fed unpadded; the
    # hidden K dims of fc2/fc3/out are zero-row padded so padded lanes stay 0.
    h1_p = _pad_to(hidden1, _LANE)
    h2_p = _pad_to(hidden2, _LANE)
    h3_p = _pad_to(hidden3, _LANE)
    c_p = _pad_to(num_classes, _LANE)

    def pad_w(w, rows, cols):
        return jnp.pad(w, ((0, rows - w.shape[0]),
                           (0, cols - w.shape[1]))).astype(jnp.bfloat16)

    def pad_b(b, cols):
        return jnp.pad(b, ((0, 0), (0, cols - b.shape[1]))).astype(jnp.float32)

    w1p, b1p = pad_w(w1, input_dim, h1_p), pad_b(b1, h1_p)
    w2p, b2p = pad_w(w2, h1_p, h2_p), pad_b(b2, h2_p)
    w3p, b3p = pad_w(w3, h2_p, h3_p), pad_b(b3, h3_p)
    w4p, b4p = pad_w(w4, h3_p, c_p), pad_b(b4, c_p)

    # --- batch tiling ---------------------------------------------------------
    # batch < 256  : single tile (too small to split usefully).
    # batch >= 256 : even number of >= 2 parallel grid steps (v7x 2-TC sharding),
    #                tile rows capped near 2048 to amortize per-step overhead.
    if batch < 256:
        tb = _pad_to(batch, _SUBLANE_BF16)
        grid_n = 1
    else:
        grid_n = max(2, _cdiv(batch, 2048))
        grid_n += grid_n % 2                    # even grid length for v7x
        tb = _pad_to(_cdiv(batch, grid_n), _SUBLANE_BF16)
    batch_p = tb * grid_n
    grid = (grid_n,)

    # Only batch-row padding (no feature padding, no dtype cast) -- skipped
    # entirely when the batch is already tile-aligned.
    xp = x if batch_p == batch else jnp.pad(x, ((0, batch_p - batch), (0, 0)))

    # --- explicit per-array index_maps (no late-binding closures) ------------
    def batch_map(i):
        return (i, 0)

    def pinned_map(i):
        return (0, 0)

    in_specs = [
        pl.BlockSpec((tb, input_dim), batch_map),       # x: follows batch grid
        pl.BlockSpec(w1p.shape, pinned_map),            # weights/biases stay
        pl.BlockSpec(b1p.shape, pinned_map),            # resident in VMEM
        pl.BlockSpec(w2p.shape, pinned_map),
        pl.BlockSpec(b2p.shape, pinned_map),
        pl.BlockSpec(w3p.shape, pinned_map),
        pl.BlockSpec(b3p.shape, pinned_map),
        pl.BlockSpec(w4p.shape, pinned_map),
        pl.BlockSpec(b4p.shape, pinned_map),
    ]
    out_spec = pl.BlockSpec((tb, c_p), batch_map)

    flops = 2 * batch_p * (input_dim * h1_p + h1_p * h2_p + h2_p * h3_p + h3_p * c_p)
    bytes_accessed = (
        int(xp.size) * 4
        + sum(int(a.size) * a.dtype.itemsize
              for a in (w1p, b1p, w2p, b2p, w3p, b3p, w4p, b4p))
        + batch_p * c_p * 2                      # bf16 output writeback
    )

    out_p = pl.pallas_call(
        _mlp_kernel,
        out_shape=jax.ShapeDtypeStruct((batch_p, c_p), jnp.bfloat16),
        grid=grid,
        in_specs=in_specs,
        out_specs=out_spec,
        compiler_params=pltpu.CompilerParams(
            dimension_semantics=("parallel",),
        ),
        cost_estimate=pl.CostEstimate(
            flops=flops, transcendentals=0, bytes_accessed=bytes_accessed),
    )(xp, w1p, b1p, w2p, b2p, w3p, b3p, w4p, b4p)

    return out_p[:batch, :num_classes].astype(jnp.float32)


def init_params(key, input_dim, hidden_dim, num_classes):
    """Deterministic synthetic init (PyTorch-like uniform fan-in scaling)."""
    dims = [
        ("fc1", input_dim, hidden_dim),
        ("fc2", hidden_dim, hidden_dim),
        ("fc3", hidden_dim, hidden_dim // 2),
        ("out", hidden_dim // 2, num_classes),
    ]
    params = {}
    for name, d_in, d_out in dims:
        key, kw, kb = jax.random.split(key, 3)
        bound = 1.0 / jnp.sqrt(d_in)
        w = jax.random.uniform(kw, (d_in, d_out), jnp.float32, -bound, bound)
        b = jax.random.uniform(kb, (1, d_out), jnp.float32, -bound, bound)
        params[name] = (w, b)
    return params


def _reference_f32(x, params):
    h = x
    for name in ("fc1", "fc2", "fc3"):
        w, b = params[name]
        h = jnp.maximum(h @ w + b, 0.0)
    w, b = params["out"]
    return h @ w + b


def _reference_bf16(x, params):
    """Mimics the kernel's numerics: bf16 matmul operands, f32 accumulate,
    bias/ReLU in f32, final result rounded to bf16."""
    h = x
    for name in ("fc1", "fc2", "fc3", "out"):
        w, b = params[name]
        h = jnp.dot(h.astype(jnp.bfloat16), w.astype(jnp.bfloat16),
                    preferred_element_type=jnp.float32) + b
        if name != "out":
            h = jnp.maximum(h, 0.0)
    return h.astype(jnp.bfloat16).astype(jnp.float32)


if __name__ == "__main__":
    key = jax.random.PRNGKey(0)
    batch, input_dim, hidden_dim, num_classes = 8, 32, 32, 4

    key, kx = jax.random.split(key)
    x = jax.random.normal(kx, (batch, input_dim), jnp.float32)
    params = init_params(key, input_dim, hidden_dim, num_classes)

    out = blurry_lines_classifier(x, params)
    out = jax.block_until_ready(out)
    assert out.shape == (batch, num_classes)

    # Tight check against a reference with matching bf16-input / f32-accumulate /
    # bf16-store numerics, plus a loose check against the pure-f32 reference.
    ref_bf16 = _reference_bf16(x, params)
    ref_f32 = _reference_f32(x, params)
    assert jnp.allclose(out, ref_bf16, atol=1e-2, rtol=1e-2), (
        float(jnp.max(jnp.abs(out - ref_bf16))))
    assert jnp.allclose(out, ref_f32, atol=5e-2, rtol=5e-2), (
        float(jnp.max(jnp.abs(out - ref_f32))))
    print("KERNEL_OK")
</pallas_src>

<mosaic_0001>
module attributes {stable_mosaic.version = 11 : i64} {
  func.func @_mlp_kernel(%arg0: i32, %arg1: memref<16x32xf32, #tpu.memory_space<vmem>>, %arg2: memref<32x128xbf16, #tpu.memory_space<vmem>>, %arg3: memref<1x128xf32, #tpu.memory_space<vmem>>, %arg4: memref<128x128xbf16, #tpu.memory_space<vmem>>, %arg5: memref<1x128xf32, #tpu.memory_space<vmem>>, %arg6: memref<128x128xbf16, #tpu.memory_space<vmem>>, %arg7: memref<1x128xf32, #tpu.memory_space<vmem>>, %arg8: memref<128x128xbf16, #tpu.memory_space<vmem>>, %arg9: memref<1x128xf32, #tpu.memory_space<vmem>>, %arg10: memref<16x128xbf16, #tpu.memory_space<vmem>>) attributes {dimension_semantics = [#tpu.dimension_semantics<parallel>], iteration_bounds = array<i64: 1>, scalar_prefetch = 0 : i64, scratch_operands = 0 : i64, tpu.core_type = #tpu.core_type<tc>, window_params = [{transform_indices = @transform_0, window_bounds = array<i64: 16, 32>}, {pipeline_mode = #tpu.pipeline_mode<synchronous>, transform_indices = @transform_1, window_bounds = array<i64: 32, 128>}, {pipeline_mode = #tpu.pipeline_mode<synchronous>, transform_indices = @transform_2, window_bounds = array<i64: 1, 128>}, {pipeline_mode = #tpu.pipeline_mode<synchronous>, transform_indices = @transform_3, window_bounds = array<i64: 128, 128>}, {pipeline_mode = #tpu.pipeline_mode<synchronous>, transform_indices = @transform_4, window_bounds = array<i64: 1, 128>}, {pipeline_mode = #tpu.pipeline_mode<synchronous>, transform_indices = @transform_5, window_bounds = array<i64: 128, 128>}, {pipeline_mode = #tpu.pipeline_mode<synchronous>, transform_indices = @transform_6, window_bounds = array<i64: 1, 128>}, {pipeline_mode = #tpu.pipeline_mode<synchronous>, transform_indices = @transform_7, window_bounds = array<i64: 128, 128>}, {pipeline_mode = #tpu.pipeline_mode<synchronous>, transform_indices = @transform_8, window_bounds = array<i64: 1, 128>}, {transform_indices = @transform_9, window_bounds = array<i64: 16, 128>}]} {
    %c0 = arith.constant 0 : index
    %c0_0 = arith.constant 0 : index
    %0 = vector.load %arg1[%c0, %c0_0] : memref<16x32xf32, #tpu.memory_space<vmem>>, vector<16x32xf32>
    %1 = arith.truncf %0 : vector<16x32xf32> to vector<16x32xbf16>
    %c0_1 = arith.constant 0 : index
    %c0_2 = arith.constant 0 : index
    %2 = vector.load %arg2[%c0_1, %c0_2] : memref<32x128xbf16, #tpu.memory_space<vmem>>, vector<32x128xbf16>
    %cst = arith.constant dense<0.000000e+00> : vector<16x128xf32>
    %3 = tpu.matmul %1, %2, %cst {dimension_numbers = #tpu.dot_dimension_numbers<[1], [0], [0], [1], [0, 0, 1, 1], [], []>} : vector<16x32xbf16>, vector<32x128xbf16>, vector<16x128xf32> -> vector<16x128xf32>
    %c0_3 = arith.constant 0 : index
    %c0_4 = arith.constant 0 : index
    %4 = vector.load %arg3[%c0_3, %c0_4] : memref<1x128xf32, #tpu.memory_space<vmem>>, vector<1x128xf32>
    %5 = vector.broadcast %4 : vector<1x128xf32> to vector<16x128xf32>
    %6 = arith.addf %3, %5 : vector<16x128xf32>
    %cst_5 = arith.constant 0.000000e+00 : f32
    %7 = vector.broadcast %cst_5 : f32 to vector<16x128xf32>
    %8 = arith.maximumf %6, %7 : vector<16x128xf32>
    %9 = arith.truncf %8 : vector<16x128xf32> to vector<16x128xbf16>
    %c0_6 = arith.constant 0 : index
    %c0_7 = arith.constant 0 : index
    %10 = vector.load %arg4[%c0_6, %c0_7] : memref<128x128xbf16, #tpu.memory_space<vmem>>, vector<128x128xbf16>
    %cst_8 = arith.constant dense<0.000000e+00> : vector<16x128xf32>
    %11 = tpu.matmul %9, %10, %cst_8 {dimension_numbers = #tpu.dot_dimension_numbers<[1], [0], [0], [1], [0, 0, 1, 1], [], []>} : vector<16x128xbf16>, vector<128x128xbf16>, vector<16x128xf32> -> vector<16x128xf32>
    %c0_9 = arith.constant 0 : index
    %c0_10 = arith.constant 0 : index
    %12 = vector.load %arg5[%c0_9, %c0_10] : memref<1x128xf32, #tpu.memory_space<vmem>>, vector<1x128xf32>
    %13 = vector.broadcast %12 : vector<1x128xf32> to vector<16x128xf32>
    %14 = arith.addf %11, %13 : vector<16x128xf32>
    %cst_11 = arith.constant 0.000000e+00 : f32
    %15 = vector.broadcast %cst_11 : f32 to vector<16x128xf32>
    %16 = arith.maximumf %14, %15 : vector<16x128xf32>
    %17 = arith.truncf %16 : vector<16x128xf32> to vector<16x128xbf16>
    %c0_12 = arith.constant 0 : index
    %c0_13 = arith.constant 0 : index
    %18 = vector.load %arg6[%c0_12, %c0_13] : memref<128x128xbf16, #tpu.memory_space<vmem>>, vector<128x128xbf16>
    %cst_14 = arith.constant dense<0.000000e+00> : vector<16x128xf32>
    %19 = tpu.matmul %17, %18, %cst_14 {dimension_numbers = #tpu.dot_dimension_numbers<[1], [0], [0], [1], [0, 0, 1, 1], [], []>} : vector<16x128xbf16>, vector<128x128xbf16>, vector<16x128xf32> -> vector<16x128xf32>
    %c0_15 = arith.constant 0 : index
    %c0_16 = arith.constant 0 : index
    %20 = vector.load %arg7[%c0_15, %c0_16] : memref<1x128xf32, #tpu.memory_space<vmem>>, vector<1x128xf32>
    %21 = vector.broadcast %20 : vector<1x128xf32> to vector<16x128xf32>
    %22 = arith.addf %19, %21 : vector<16x128xf32>
    %cst_17 = arith.constant 0.000000e+00 : f32
    %23 = vector.broadcast %cst_17 : f32 to vector<16x128xf32>
    %24 = arith.maximumf %22, %23 : vector<16x128xf32>
    %25 = arith.truncf %24 : vector<16x128xf32> to vector<16x128xbf16>
    %c0_18 = arith.constant 0 : index
    %c0_19 = arith.constant 0 : index
    %26 = vector.load %arg8[%c0_18, %c0_19] : memref<128x128xbf16, #tpu.memory_space<vmem>>, vector<128x128xbf16>
    %cst_20 = arith.constant dense<0.000000e+00> : vector<16x128xf32>
    %27 = tpu.matmul %25, %26, %cst_20 {dimension_numbers = #tpu.dot_dimension_numbers<[1], [0], [0], [1], [0, 0, 1, 1], [], []>} : vector<16x128xbf16>, vector<128x128xbf16>, vector<16x128xf32> -> vector<16x128xf32>
    %c0_21 = arith.constant 0 : index
    %c0_22 = arith.constant 0 : index
    %28 = vector.load %arg9[%c0_21, %c0_22] : memref<1x128xf32, #tpu.memory_space<vmem>>, vector<1x128xf32>
    %29 = vector.broadcast %28 : vector<1x128xf32> to vector<16x128xf32>
    %30 = arith.addf %27, %29 : vector<16x128xf32>
    %31 = arith.truncf %30 : vector<16x128xf32> to vector<16x128xbf16>
    %c0_23 = arith.constant 0 : index
    %c0_24 = arith.constant 0 : index
    %32 = vector.load %arg10[%c0_23, %c0_24] : memref<16x128xbf16, #tpu.memory_space<vmem>>, vector<16x128xbf16>
    tpu.vector_store %arg10[%c0_23, %c0_24], %31 {strides = array<i32>} : memref<16x128xbf16, #tpu.memory_space<vmem>>, vector<16x128xbf16>,
    return
  }
  func.func @transform_0(%arg0: i32) -> (i32, i32) {
    %c0_i32 = arith.constant 0 : i32
    %c0_i32_0 = arith.constant 0 : i32
    return %arg0, %c0_i32 : i32, i32
  }
  func.func @transform_1(%arg0: i32) -> (i32, i32) {
    %c0_i32 = arith.constant 0 : i32
    %c0_i32_0 = arith.constant 0 : i32
    %c0_i32_1 = arith.constant 0 : i32
    return %c0_i32, %c0_i32_0 : i32, i32
  }
  func.func @transform_2(%arg0: i32) -> (i32, i32) {
    %c0_i32 = arith.constant 0 : i32
    %c0_i32_0 = arith.constant 0 : i32
    %c0_i32_1 = arith.constant 0 : i32
    return %c0_i32, %c0_i32_0 : i32, i32
  }
  func.func @transform_3(%arg0: i32) -> (i32, i32) {
    %c0_i32 = arith.constant 0 : i32
    %c0_i32_0 = arith.constant 0 : i32
    %c0_i32_1 = arith.constant 0 : i32
    return %c0_i32, %c0_i32_0 : i32, i32
  }
  func.func @transform_4(%arg0: i32) -> (i32, i32) {
    %c0_i32 = arith.constant 0 : i32
    %c0_i32_0 = arith.constant 0 : i32
    %c0_i32_1 = arith.constant 0 : i32
    return %c0_i32, %c0_i32_0 : i32, i32
  }
  func.func @transform_5(%arg0: i32) -> (i32, i32) {
    %c0_i32 = arith.constant 0 : i32
    %c0_i32_0 = arith.constant 0 : i32
    %c0_i32_1 = arith.constant 0 : i32
    return %c0_i32, %c0_i32_0 : i32, i32
  }
  func.func @transform_6(%arg0: i32) -> (i32, i32) {
    %c0_i32 = arith.constant 0 : i32
    %c0_i32_0 = arith.constant 0 : i32
    %c0_i32_1 = arith.constant 0 : i32
    return %c0_i32, %c0_i32_0 : i32, i32
  }
  func.func @transform_7(%arg0: i32) -> (i32, i32) {
    %c0_i32 = arith.constant 0 : i32
    %c0_i32_0 = arith.constant 0 : i32
    %c0_i32_1 = arith.constant 0 : i32
    return %c0_i32, %c0_i32_0 : i32, i32
  }
  func.func @transform_8(%arg0: i32) -> (i32, i32) {
    %c0_i32 = arith.constant 0 : i32
    %c0_i32_0 = arith.constant 0 : i32
    %c0_i32_1 = arith.constant 0 : i32
    return %c0_i32, %c0_i32_0 : i32, i32
  }
  func.func @transform_9(%arg0: i32) -> (i32, i32) {
    %c0_i32 = arith.constant 0 : i32
    %c0_i32_0 = arith.constant 0 : i32
    return %arg0, %c0_i32 : i32, i32
  }
}

</mosaic_0001>

<bundles_post_ra>
// kernel: blurry_lines_classifier.1
= control target key start
LH: loop header
LB: loop body
LE: loop exit
PB: predicated region body
PF: predicated region fallthrough
CT: control target
= control target key end

     0   :  { %v629_v0 = vmov 0.0   ;;  %vm630_vm0 = vmmov 0   ;;  %vm59_vm1 = vcmask 261120   ;;  %s814_s1 = inlined_call_operand.vmem [shape: bf16[32,128], index: 1, kind: input, shape index: {}]   ;;  %s815_s0 = inlined_call_operand.vmem [shape: f32[16,32], index: 0, kind: input, shape index: {}]   ;;  %s816_s3 = inlined_call_operand.vmem [shape: bf16[128,128], index: 3, kind: input, shape index: {}]   ;;  %s817_s5 = inlined_call_operand.vmem [shape: bf16[128,128], index: 5, kind: input, shape index: {}]   ;;  %s818_s2 = inlined_call_operand.vmem [shape: f32[1,128], index: 2, kind: input, shape index: {}]   ;;  %s819_s7 = inlined_call_operand.vmem [shape: bf16[128,128], index: 7, kind: input, shape index: {}]   ;;  %s820_s4 = inlined_call_operand.vmem [shape: f32[1,128], index: 4, kind: input, shape index: {}]   ;;  %s821_s6 = inlined_call_operand.vmem [shape: f32[1,128], index: 6, kind: input, shape index: {}]   ;;  %s822_s8 = inlined_call_operand.vmem [shape: f32[1,128], index: 8, kind: input, shape index: {}]   ;;  %s823_s9 = inlined_call_operand.vmem [shape: bf16[16,128], index: 9, kind: output, shape index: {}]  }
   0x1   :  { %533 = vmatprep.subr.bf16.mxu0 %v629_v0  ;;  %v603_v1 = vld [vmem:[%s814_s1 + $0x8] sm:$0xff]   ;;  %537 = vmatprep.mubr.msk.bf16.mxu0 %vm630_vm0, %v629_v0  ;;  %v604_v2 = vld [vmem:[%s814_s1] sm:$0xff]   ;;  %v605_v5 = vld [vmem:[%s816_s3 + $0x38] sm:$0xff]  }
   0x2   :  { %541 = vmatprep.subr.bf16.mxu1 %v629_v0  ;;  %557 = vmatprep.mubr.msk.bf16.mxu1 %vm630_vm0, %v629_v0  ;;  %v33_v3 = vld [vmem:[%s815_s0] sm:$0xff]  ;;  %v34_v4 = vld [vmem:[%s815_s0 + $0x8] sm:$0xff]  ;;  %v606_v7 = vld [vmem:[%s816_s3 + $0x30] sm:$0xff]  }
   0x3   :  { %534 = vmatpush3.bf16.msra.mxu0 %v603_v1  ;;  %v35_v6 = vpack.c.bf16 %v34_v4, %v33_v3  ;;  %542 = vmatpush3.bf16.msra.mxu1 %v605_v5  ;;  %v607_v8 = vld [vmem:[%s816_s3 + $0x28] sm:$0xff]   ;;  %v608_v9 = vld [vmem:[%s816_s3 + $0x20] sm:$0xff]   ;;  %v609_v10 = vld [vmem:[%s816_s3 + $0x18] sm:$0xff]  }
   0x4   :  { %535 = vmatprep.subr.bf16.mxu0 %v629_v0  ;;  %543 = vmatprep.subr.bf16.mxu1 %v629_v0  ;;  %v610_v11 = vld [vmem:[%s816_s3 + $0x10] sm:$0xff]   ;;  %v611_v12 = vld [vmem:[%s816_s3 + $0x8] sm:$0xff]   ;;  %v612_v13 = vld [vmem:[%s816_s3] sm:$0xff]  }
   0x5   :  { %v613_v14 = vld [vmem:[%s817_s5 + $0x38] sm:$0xff]   ;;  %v614_v15 = vld [vmem:[%s817_s5 + $0x30] sm:$0xff]   ;;  %v615_v16 = vld [vmem:[%s817_s5 + $0x28] sm:$0xff]  }
   0x6   :  { %v616_v17 = vld [vmem:[%s817_s5 + $0x20] sm:$0xff]   ;;  %v617_v18 = vld [vmem:[%s817_s5 + $0x18] sm:$0xff]   ;;  %v618_v29 = vld [vmem:[%s817_s5 + $0x10] sm:$0xff]  }
   0x7   :  { %536 = vmatpush3.bf16.msra.mxu0 %v604_v2  ;;  %544 = vmatpush3.bf16.msra.mxu1 %v606_v7  ;;  %v463_v19 = vld [vmem:[%s818_s2] ss:$0 sm:$0xff]  ;;  %v619_v30 = vld [vmem:[%s817_s5 + $0x8] sm:$0xff]   ;;  %v621_v32 = vld [vmem:[%s819_s7 + $0x38] sm:$0xff]  }
   0x8   :  { %561 = vmatprep.subr.bf16.mxu0 %v629_v0  ;;  %545 = vmatprep.subr.bf16.mxu1 %v629_v0  ;;  %v620_v31 = vld [vmem:[%s817_s5] sm:$0xff]   ;;  %v622_v33 = vld [vmem:[%s819_s7 + $0x30] sm:$0xff]   ;;  %v623_v34 = vld [vmem:[%s819_s7 + $0x28] sm:$0xff]  }
   0x9   :  { %v624_v35 = vld [vmem:[%s819_s7 + $0x20] sm:$0xff]   ;;  %v625_v36 = vld [vmem:[%s819_s7 + $0x18] sm:$0xff]   ;;  %v626_v47 = vld [vmem:[%s819_s7 + $0x10] sm:$0xff]  }
   0xa   :  { %538 = vmatmul.mubr.msk.bf16.vlgmr.msra.gmra.mxu0 %vm59_vm1, %v35_v6  ;;  %v467_v37 = vld [vmem:[%s820_s4] ss:$0 sm:$0xff]  ;;  %v627_v48 = vld [vmem:[%s819_s7 + $0x8] sm:$0xff]  }
   0xb   :  { %577 = vmatprep.mubr.msk.bf16.mxu0 %vm630_vm0, %v629_v0  ;;  %546 = vmatpush3.bf16.msra.mxu1 %v607_v8  ;;  %v628_v49 = vld [vmem:[%s819_s7] sm:$0xff]  }
   0xc   :  { %547 = vmatprep.subr.bf16.mxu1 %v629_v0  ;;  %562 = vmatpush3.bf16.msra.mxu0 %v613_v14  ;;  %v476_v50 = vld [vmem:[%s821_s6] ss:$0 sm:$0xff] }
   0xd   :  { %563 = vmatprep.subr.bf16.mxu0 %v629_v0  ;;  %v485_v61 = vld [vmem:[%s822_s8] ss:$0 sm:$0xff] }
   0xf   :  { %548 = vmatpush3.bf16.msra.mxu1 %v608_v9 }
  0x10   :  { %549 = vmatprep.subr.bf16.mxu1 %v629_v0  ;;  %564 = vmatpush3.bf16.msra.mxu0 %v614_v15 }
  0x11   :  { %565 = vmatprep.subr.bf16.mxu0 %v629_v0 }
  0x13   :  { %550 = vmatpush3.bf16.msra.mxu1 %v609_v10 }
  0x14   :  { %551 = vmatprep.subr.bf16.mxu1 %v629_v0  ;;  %566 = vmatpush3.bf16.msra.mxu0 %v615_v16 }
  0x15   :  { %567 = vmatprep.subr.bf16.mxu0 %v629_v0 }
  0x17   :  { %552 = vmatpush3.bf16.msra.mxu1 %v610_v11 }
  0x18   :  { %553 = vmatprep.subr.bf16.mxu1 %v629_v0  ;;  %568 = vmatpush3.bf16.msra.mxu0 %v616_v17 }
  0x19   :  { %569 = vmatprep.subr.bf16.mxu0 %v629_v0 }
  0x1b   :  { %554 = vmatpush3.bf16.msra.mxu1 %v611_v12 }
  0x1c   :  { %555 = vmatprep.subr.bf16.mxu1 %v629_v0  ;;  %570 = vmatpush3.bf16.msra.mxu0 %v617_v18 }
  0x1d   :  { %571 = vmatprep.subr.bf16.mxu0 %v629_v0 }
  0x1f   :  { %556 = vmatpush3.bf16.msra.mxu1 %v612_v13 }
  0x20   :  { %581 = vmatprep.subr.bf16.mxu1 %v629_v0  ;;  %572 = vmatpush3.bf16.msra.mxu0 %v618_v29 }
  0x21   :  { %573 = vmatprep.subr.bf16.mxu0 %v629_v0 }
  0x24   :  { %574 = vmatpush3.bf16.msra.mxu0 %v619_v30 }
  0x25   :  { %575 = vmatprep.subr.bf16.mxu0 %v629_v0 }
  0x28   :  { %576 = vmatpush3.bf16.msra.mxu0 %v620_v31 }
  0xca   :  { %v97_v20 = vpop.f32.mrf.mxu0 }
  0xcb   :  { %v98_v22 = vadd.f32 %v463_v19, %v97_v20 }
  0xcc   :  { %v539_v21 = vpop.f32.mrf.mxu0 }
  0xcd   :  { %v104_v26 = vmax.f32 %v98_v22, 0.0 }
  0xce   :  { %v100_v23 = vpop.f32.mrf.mxu0 }
  0xcf   :  { %v101_v24 = vadd.f32 %v463_v19, %v100_v23 }
  0xd0   :  { %v540_v25 = vpop.f32.mrf.mxu0 }
  0xd1   :  { %v105_v27 = vmax.f32 %v101_v24, 0.0 }
  0xd3   :  { %v106_v28 = vpack.c.bf16 %v105_v27, %v104_v26 }
  0xd5   :  { %558 = vmatmul.mubr.bf16.vlgmr.msra.gmra.mxu1 %v106_v28 }
  0xd6   :  { %597 = vmatprep.mubr.msk.bf16.mxu1 %vm630_vm0, %v629_v0  ;;  %582 = vmatpush3.bf16.msra.mxu1 %v621_v32 }
  0xd7   :  { %583 = vmatprep.subr.bf16.mxu1 %v629_v0 }
  0xda   :  { %584 = vmatpush3.bf16.msra.mxu1 %v622_v33 }
  0xdb   :  { %585 = vmatprep.subr.bf16.mxu1 %v629_v0 }
  0xde   :  { %586 = vmatpush3.bf16.msra.mxu1 %v623_v34 }
  0xdf   :  { %587 = vmatprep.subr.bf16.mxu1 %v629_v0 }
  0xe2   :  { %588 = vmatpush3.bf16.msra.mxu1 %v624_v35 }
  0xe3   :  { %589 = vmatprep.subr.bf16.mxu1 %v629_v0 }
  0xe6   :  { %590 = vmatpush3.bf16.msra.mxu1 %v625_v36 }
  0xe7   :  { %591 = vmatprep.subr.bf16.mxu1 %v629_v0 }
  0xea   :  { %592 = vmatpush3.bf16.msra.mxu1 %v626_v47 }
  0xeb   :  { %593 = vmatprep.subr.bf16.mxu1 %v629_v0 }
  0xee   :  { %594 = vmatpush3.bf16.msra.mxu1 %v627_v48 }
  0xef   :  { %595 = vmatprep.subr.bf16.mxu1 %v629_v0 }
  0xf2   :  { %596 = vmatpush3.bf16.msra.mxu1 %v628_v49 }
 0x195   :  { %v212_v38 = vpop.f32.mrf.mxu1 }
 0x196   :  { %v213_v40 = vadd.f32 %v467_v37, %v212_v38 }
 0x197   :  { %v559_v39 = vpop.f32.mrf.mxu1 }
 0x198   :  { %v219_v44 = vmax.f32 %v213_v40, 0.0 }
 0x199   :  { %v215_v41 = vpop.f32.mrf.mxu1 }
 0x19a   :  { %v216_v42 = vadd.f32 %v467_v37, %v215_v41 }
 0x19b   :  { %v560_v43 = vpop.f32.mrf.mxu1 }
 0x19c   :  { %v220_v45 = vmax.f32 %v216_v42, 0.0 }
 0x19e   :  { %v221_v46 = vpack.c.bf16 %v220_v45, %v219_v44 }
 0x1a0   :  { %578 = vmatmul.mubr.bf16.vlgmr.msra.gmra.mxu0 %v221_v46 }
 0x260   :  { %v327_v51 = vpop.f32.mrf.mxu0 }
 0x261   :  { %v328_v53 = vadd.f32 %v476_v50, %v327_v51 }
 0x262   :  { %v579_v52 = vpop.f32.mrf.mxu0 }
 0x263   :  { %v334_v57 = vmax.f32 %v328_v53, 0.0 }
 0x264   :  { %v330_v54 = vpop.f32.mrf.mxu0 }
 0x265   :  { %v331_v55 = vadd.f32 %v476_v50, %v330_v54 }
 0x266   :  { %v580_v56 = vpop.f32.mrf.mxu0 }
 0x267   :  { %v335_v58 = vmax.f32 %v331_v55, 0.0 }
 0x269   :  { %v336_v59 = vpack.c.bf16 %v335_v58, %v334_v57 }
 0x26b   :  { %598 = vmatmul.mubr.bf16.vlgmr.msra.gmra.mxu1 %v336_v59 }
 0x32b   :  { %v442_v60 = vpop.f32.mrf.mxu1 }
 0x32c   :  { %v443_v0 = vadd.f32 %v485_v61, %v442_v60 }
 0x32d   :  { %v599_v62 = vpop.f32.mrf.mxu1 }
 0x32f   :  { %v445_v63 = vpop.f32.mrf.mxu1 }
 0x330   :  { %v446_v1 = vadd.f32 %v485_v61, %v445_v63 }
 0x331   :  { %v600_v2 = vpop.f32.mrf.mxu1 }
 0x332   :  { %v501_v3 = vpack.c.bf16 %v446_v1, %v443_v0 }
 0x334   :  { %502 = vst [vmem:[%s823_s9] sm:$0xff] %v501_v3  }

</bundles_post_ra>
